<compile_context>
chip_gen: v6e
topology: v6e:2x2x1
jax: 0.10.0
libtpu: 0.0.40
codegen_flags: <defaults>
</compile_context>

<pallas_src>
import math

import jax
import jax.numpy as jnp
from jax.experimental import pallas as pl
from jax.experimental.pallas import tpu as pltpu


_LANE = 128
_LANE_TILE_CAP = 2048            # max lane-tile width (elements)


def _vmem_budgets():
    """(vmem_limit_bytes, per-x-tile byte budget), sized per TPU generation."""
    try:
        phys = getattr(pltpu.get_tpu_info(), "vmem_capacity_bytes", None)
    except Exception:
        phys = None
    if phys is None:
        phys = 64 * 1024 * 1024                        # assume smallest (v7x-like)
    if phys >= 96 * 1024 * 1024:                       # v5e / v6e: 128 MiB physical
        return 96 * 1024 * 1024, 8 * 1024 * 1024
    return 48 * 1024 * 1024, 4 * 1024 * 1024           # v7x: 64 MiB physical


def _sublane_multiple(itemsize):
    # dtype-native packed sublane tiling: f32 -> 8, bf16 -> 16, int8/fp8 -> 32.
    return max(8, 32 // max(1, itemsize))


def _largest_divisor(n, multiple, cap):
    """Largest divisor of n that is a multiple of `multiple` and <= cap (or None)."""
    best = None
    for cand in range(multiple, min(n, cap) + 1, multiple):
        if n % cand == 0:
            best = cand
    return best


def _pick_fused_channel_tile(C, N, Lp, itemsize, sub, vmem_limit):
    """Channel-group size tc for the fused stats+apply kernel, or None if even the
    smallest legal group's (N, tc, Lp) strip cannot fit the VMEM working set
    (2x double-buffered input + 2x output in the input dtype + ~3 f32 temps)."""
    bytes_per_elem = 4 * itemsize + 12
    max_tc = (int(0.8 * vmem_limit) // bytes_per_elem) // max(1, N * Lp)
    if max_tc < 1:
        return None
    # Block second-minor dim must be a multiple of 8 or the full channel extent.
    cands = [d for d in range(1, C + 1)
             if C % d == 0 and (d % 8 == 0 or d == C) and d <= max_tc]
    if not cands:
        return None

    # Prefer >=4 (else >=2) channel groups so the grid both pipelines and can split
    # across TensorCores (v7x megacore); then dtype-aligned tc; then largest tc.
    def score(d):
        return (min(C // d, 4), d % sub == 0, d)

    return max(cands, key=score)


def _make_fused_kernel(inv_m, eps, exact_lane):
    """Fused pass: per-channel mean/var over the resident (N, tc, Lp) strip, then
    y = (x - mean) * (w * rsqrt(var + eps)) + b, all from VMEM (x read once)."""

    def kernel(x_ref, w_ref, b_ref, y_ref, mean_ref, var_ref):
        xf = x_ref[...].astype(jnp.float32)                       # (N, tc, Lp)
        s = jnp.sum(xf, axis=2, keepdims=True)                    # (N, tc, 1)
        mean = jnp.sum(s, axis=0, keepdims=True) * inv_m          # (1, tc, 1)
        d = xf - mean
        if exact_lane:
            v = jnp.sum(d * d, axis=2, keepdims=True)
        else:
            # Spatial zero-padding contributes exactly 0 to x * (x - mean).
            v = jnp.sum(d * xf, axis=2, keepdims=True)
        var = jnp.maximum(jnp.sum(v, axis=0, keepdims=True) * inv_m, 0.0)
        scale = w_ref[...] * jax.lax.rsqrt(var + eps)
        y_ref[...] = (d * scale + b_ref[...]).astype(y_ref.dtype)
        mean_ref[...] = mean
        var_ref[...] = var

    return kernel


def _make_stats_kernel(tl, lane):
    """Accumulate per-row sum / sum-of-squares (f32) over the lane grid axis into a
    resident (tr, lane) block.  lane == 128 keeps the hot-loop accumulation on the
    VALU (lane-dense chunk adds); the final 128 -> 1 reduce happens once in XLA."""
    n_chunks = tl // lane

    def kernel(x_ref, sum_ref, sumsq_ref):
        @pl.when(pl.program_id(1) == 0)
        def _():
            sum_ref[...] = jnp.zeros_like(sum_ref)
            sumsq_ref[...] = jnp.zeros_like(sumsq_ref)

        xf = x_ref[...].astype(jnp.float32)                       # (tr, tl)
        if lane == 1:
            sum_ref[...] += jnp.sum(xf, axis=1, keepdims=True)
            sumsq_ref[...] += jnp.sum(xf * xf, axis=1, keepdims=True)
        else:
            s = xf[:, 0:lane]
            q = s * s
            for k in range(1, n_chunks):                          # <= 16 unrolled adds
                c = xf[:, k * lane:(k + 1) * lane]
                s = s + c
                q = q + c * c
            sum_ref[...] += s
            sumsq_ref[...] += q

    return kernel


def _bn_apply_kernel(x_ref, scale_ref, shift_ref, o_ref):
    """y = x * scale + shift with per-row scale/shift (one FMA per element)."""
    y = x_ref[...].astype(jnp.float32) * scale_ref[...] + shift_ref[...]
    o_ref[...] = y.astype(o_ref.dtype)


def batch_norm_pallas(x, weight, bias, running_mean, running_var,
                      *, eps=1e-5, momentum=0.1, training=True, fuse=None):
    """F.batch_norm on (N, C, ...) input (native NCHW layout, no transpose).

    Returns (y, new_running_mean, new_running_var).  `fuse=False` forces the
    two-pass (stats + apply) fallback path (used for testing)."""
    orig_shape = x.shape
    N, C = x.shape[0], x.shape[1]
    L = int(math.prod(x.shape[2:])) if x.ndim > 2 else 1
    M = N * L
    itemsize = jnp.dtype(x.dtype).itemsize
    sub = _sublane_multiple(itemsize)
    vmem_limit, tile_budget = _vmem_budgets()

    if bias is None:
        bias = jnp.zeros((C,), jnp.float32)
    w_f32 = weight.astype(jnp.float32)
    b_f32 = bias.astype(jnp.float32)
    rm_f32 = running_mean.astype(jnp.float32)
    rv_f32 = running_var.astype(jnp.float32)

    # ---- lane (spatial) tiling: lane-dense (x128) tiles whenever possible --------
    if L % _LANE == 0:
        tl = _largest_divisor(L, _LANE, _LANE_TILE_CAP) or _LANE
        Lp = L
    elif L <= _LANE_TILE_CAP:
        tl, Lp = L, L                          # small/awkward L: full-dim lane block
    else:
        tl = _LANE_TILE_CAP                    # large awkward L: pad to a x128 tile
        Lp = -(-L // tl) * tl

    x3 = x.reshape(N, C, L)                    # layout-preserving reshape
    if Lp != L:
        x3 = jnp.pad(x3, ((0, 0), (0, 0), (0, Lp - L)))

    # ---- training fast path: fused stats + apply, x read from HBM exactly once ---
    if training and fuse is not False:
        tc_f = _pick_fused_channel_tile(C, N, Lp, itemsize, sub, vmem_limit)
        if tc_f is not None:
            y3, mean3, var3 = pl.pallas_call(
                _make_fused_kernel(1.0 / M, float(eps), Lp == L),
                out_shape=(jax.ShapeDtypeStruct((N, C, Lp), x.dtype),
                           jax.ShapeDtypeStruct((1, C, 1), jnp.float32),
                           jax.ShapeDtypeStruct((1, C, 1), jnp.float32)),
                grid=(C // tc_f,),
                in_specs=[pl.BlockSpec((N, tc_f, Lp), lambda ci: (0, ci, 0)),
                          pl.BlockSpec((1, tc_f, 1), lambda ci: (0, ci, 0)),
                          pl.BlockSpec((1, tc_f, 1), lambda ci: (0, ci, 0))],
                out_specs=(pl.BlockSpec((N, tc_f, Lp), lambda ci: (0, ci, 0)),
                           pl.BlockSpec((1, tc_f, 1), lambda ci: (0, ci, 0)),
                           pl.BlockSpec((1, tc_f, 1), lambda ci: (0, ci, 0))),
                compiler_params=pltpu.CompilerParams(
                    dimension_semantics=("parallel",),
                    vmem_limit_bytes=vmem_limit),
            )(x3, w_f32.reshape(1, C, 1), b_f32.reshape(1, C, 1))

            mean = mean3.reshape(C)
            var = var3.reshape(C)                                  # biased (for y)
            unbiased = var * (float(M) / float(max(M - 1, 1)))
            new_rm = (1.0 - momentum) * rm_f32 + momentum * mean
            new_rv = (1.0 - momentum) * rv_f32 + momentum * unbiased
            y = (y3[:, :, :L] if Lp != L else y3).reshape(orig_shape)
            return (y, new_rm.astype(running_mean.dtype),
                    new_rv.astype(running_var.dtype))

    # ---- general path: 2-D (N*C, Lp) fold so sublanes stay fully populated -------
    R = N * C
    x2 = x3.reshape(R, Lp)
    max_tr = max(sub, (tile_budget // max(1, tl * itemsize)) // sub * sub)
    tr = _largest_divisor(R, sub, max_tr)
    Rp = R
    if tr is None:
        if R * tl * itemsize <= 2 * tile_budget:
            tr = R                             # small/awkward R: full-dim row block
        else:
            tr = max_tr                        # large awkward R: pad rows (bounded tile)
            Rp = -(-R // tr) * tr
            x2 = jnp.pad(x2, ((0, Rp - R), (0, 0)))
    n_rt, n_lt = Rp // tr, Lp // tl
    lane = _LANE if tl % _LANE == 0 else 1

    if training:
        sum_rows, sumsq_rows = pl.pallas_call(
            _make_stats_kernel(tl, lane),
            out_shape=(jax.ShapeDtypeStruct((Rp, lane), jnp.float32),
                       jax.ShapeDtypeStruct((Rp, lane), jnp.float32)),
            grid=(n_rt, n_lt),
            in_specs=[pl.BlockSpec((tr, tl), lambda ri, li: (ri, li))],
            out_specs=(pl.BlockSpec((tr, lane), lambda ri, li: (ri, 0)),
                       pl.BlockSpec((tr, lane), lambda ri, li: (ri, 0))),
            compiler_params=pltpu.CompilerParams(
                dimension_semantics=("parallel", "arbitrary"),
                vmem_limit_bytes=vmem_limit),
        )(x2)
        # Tiny [N, C, lane]-sized finish in XLA: fold rows back to channels.
        ch_sum = sum_rows[:R].reshape(N, C, lane).sum(axis=(0, 2))
        ch_sumsq = sumsq_rows[:R].reshape(N, C, lane).sum(axis=(0, 2))
        mean = ch_sum / M
        # E[x^2]-E[x]^2 in f32; clamp tiny negative round-off (fused path avoids this).
        var = jnp.maximum(ch_sumsq / M - mean * mean, 0.0)
        unbiased = var * (float(M) / float(max(M - 1, 1)))
        new_rm = (1.0 - momentum) * rm_f32 + momentum * mean
        new_rv = (1.0 - momentum) * rv_f32 + momentum * unbiased
    else:
        mean, var = rm_f32, rv_f32
        new_rm, new_rv = rm_f32, rv_f32

    # Fold everything into one per-row scale/shift (tiny [N*C]-sized glue in XLA).
    inv_std = jax.lax.rsqrt(var + eps)
    scale_c = w_f32 * inv_std
    shift_c = b_f32 - mean * scale_c
    scale_rows = jnp.tile(scale_c[None, :], (N, 1)).reshape(R, 1)
    shift_rows = jnp.tile(shift_c[None, :], (N, 1)).reshape(R, 1)
    if Rp != R:
        scale_rows = jnp.pad(scale_rows, ((0, Rp - R), (0, 0)))
        shift_rows = jnp.pad(shift_rows, ((0, Rp - R), (0, 0)))

    y2 = pl.pallas_call(
        _bn_apply_kernel,
        out_shape=jax.ShapeDtypeStruct((Rp, Lp), x.dtype),
        grid=(n_rt, n_lt),
        in_specs=[pl.BlockSpec((tr, tl), lambda ri, li: (ri, li)),
                  pl.BlockSpec((tr, 1), lambda ri, li: (ri, 0)),
                  pl.BlockSpec((tr, 1), lambda ri, li: (ri, 0))],
        out_specs=pl.BlockSpec((tr, tl), lambda ri, li: (ri, li)),
        compiler_params=pltpu.CompilerParams(
            dimension_semantics=("parallel", "parallel"),
            vmem_limit_bytes=vmem_limit),
    )(x2, scale_rows, shift_rows)

    if Rp != R or Lp != L:
        y2 = y2[:R, :L]
    y = y2.reshape(orig_shape)
    return (y, new_rm.astype(running_mean.dtype),
            new_rv.astype(running_var.dtype))


def _reference(x, w, b, rm, rv, eps, momentum, training):
    xf = x.astype(jnp.float32)
    if training:
        mean = jnp.mean(xf, axis=(0, 2, 3))
        var = jnp.var(xf, axis=(0, 2, 3))
        m = x.shape[0] * x.shape[2] * x.shape[3]
        new_rm = (1 - momentum) * rm + momentum * mean
        new_rv = (1 - momentum) * rv + momentum * var * (m / (m - 1))
    else:
        mean, var = rm, rv
        new_rm, new_rv = rm, rv
    mean_b = mean[None, :, None, None]
    var_b = var[None, :, None, None]
    y = (xf - mean_b) / jnp.sqrt(var_b + eps) * w[None, :, None, None] + b[None, :, None, None]
    return y.astype(x.dtype), new_rm, new_rv


if __name__ == "__main__":
    key = jax.random.PRNGKey(0)
    k_x, k_w = jax.random.split(key)

    N, C, H, W = 2, 4, 16, 16
    x = jax.random.normal(k_x, (N, C, H, W), dtype=jnp.float32)

    # _BatchNorm.reset_parameters(): weight ~ U[0,1), bias = 0,
    # running_mean = 0, running_var = 1.
    weight = jax.random.uniform(k_w, (C,), dtype=jnp.float32)
    bias = jnp.zeros((C,), dtype=jnp.float32)
    running_mean = jnp.zeros((C,), dtype=jnp.float32)
    running_var = jnp.ones((C,), dtype=jnp.float32)

    eps, momentum = 1e-5, 0.1

    # 1) Training forward: fused single-pass kernel (default path).
    y, new_rm, new_rv = batch_norm_pallas(
        x, weight, bias, running_mean, running_var,
        eps=eps, momentum=momentum, training=True)
    jax.block_until_ready((y, new_rm, new_rv))
    y_ref, rm_r, rv_r = _reference(
        x, weight, bias, running_mean, running_var, eps, momentum, True)
    assert jnp.allclose(y, y_ref, atol=1e-4, rtol=1e-4)
    assert jnp.allclose(new_rm, rm_r, atol=1e-5, rtol=1e-5)
    assert jnp.allclose(new_rv, rv_r, atol=1e-5, rtol=1e-5)

    # 2) Training forward: forced two-pass (stats + apply) fallback path.
    y2p, rm2p, rv2p = batch_norm_pallas(
        x, weight, bias, running_mean, running_var,
        eps=eps, momentum=momentum, training=True, fuse=False)
    jax.block_until_ready((y2p, rm2p, rv2p))
    assert jnp.allclose(y2p, y_ref, atol=1e-4, rtol=1e-4)
    assert jnp.allclose(rm2p, rm_r, atol=1e-5, rtol=1e-5)
    assert jnp.allclose(rv2p, rv_r, atol=1e-5, rtol=1e-5)

    # 3) Eval forward (uses running stats; single apply pass).
    y_e, _, _ = batch_norm_pallas(
        x, weight, bias, new_rm, new_rv,
        eps=eps, momentum=momentum, training=False)
    jax.block_until_ready(y_e)
    y_eref, _, _ = _reference(x, weight, bias, new_rm, new_rv, eps, momentum, False)
    assert jnp.allclose(y_e, y_eref, atol=1e-4, rtol=1e-4)

    print("KERNEL_OK")
</pallas_src>

<mosaic_0001>
module attributes {stable_mosaic.version = 11 : i64} {
  func.func @kernel(%arg0: i32, %arg1: memref<2x4x256xf32, #tpu.memory_space<vmem>>, %arg2: memref<1x4x1xf32, #tpu.memory_space<vmem>>, %arg3: memref<1x4x1xf32, #tpu.memory_space<vmem>>, %arg4: memref<2x4x256xf32, #tpu.memory_space<vmem>>, %arg5: memref<1x4x1xf32, #tpu.memory_space<vmem>>, %arg6: memref<1x4x1xf32, #tpu.memory_space<vmem>>) attributes {dimension_semantics = [#tpu.dimension_semantics<parallel>], iteration_bounds = array<i64: 1>, scalar_prefetch = 0 : i64, scratch_operands = 0 : i64, tpu.core_type = #tpu.core_type<tc>, window_params = [{transform_indices = @transform_0, window_bounds = array<i64: 2, 4, 256>}, {transform_indices = @transform_1, window_bounds = array<i64: 1, 4, 1>}, {transform_indices = @transform_2, window_bounds = array<i64: 1, 4, 1>}, {transform_indices = @transform_3, window_bounds = array<i64: 2, 4, 256>}, {transform_indices = @transform_4, window_bounds = array<i64: 1, 4, 1>}, {transform_indices = @transform_5, window_bounds = array<i64: 1, 4, 1>}]} {
    %c0 = arith.constant 0 : index
    %c0_0 = arith.constant 0 : index
    %c0_1 = arith.constant 0 : index
    %0 = vector.load %arg1[%c0, %c0_0, %c0_1] : memref<2x4x256xf32, #tpu.memory_space<vmem>>, vector<2x4x256xf32>
    %cst = arith.constant dense<0.000000e+00> : vector<2x4xf32>
    %1 = vector.multi_reduction <add>, %0, %cst [2] : vector<2x4x256xf32> to vector<2x4xf32>
    %2 = vector.shape_cast %1 : vector<2x4xf32> to vector<2x4x1xf32>
    %cst_2 = arith.constant dense<0.000000e+00> : vector<4x1xf32>
    %3 = vector.multi_reduction <add>, %2, %cst_2 [0] : vector<2x4x1xf32> to vector<4x1xf32>
    %4 = vector.shape_cast %3 : vector<4x1xf32> to vector<1x4x1xf32>
    %cst_3 = arith.constant 0.001953125 : f32
    %5 = vector.broadcast %cst_3 : f32 to vector<1x4x1xf32>
    %6 = arith.mulf %4, %5 : vector<1x4x1xf32>
    %7 = vector.broadcast %6 : vector<1x4x1xf32> to vector<2x4x256xf32>
    %8 = arith.subf %0, %7 : vector<2x4x256xf32>
    %9 = arith.mulf %8, %8 : vector<2x4x256xf32>
    %cst_4 = arith.constant dense<0.000000e+00> : vector<2x4xf32>
    %10 = vector.multi_reduction <add>, %9, %cst_4 [2] : vector<2x4x256xf32> to vector<2x4xf32>
    %11 = vector.shape_cast %10 : vector<2x4xf32> to vector<2x4x1xf32>
    %cst_5 = arith.constant dense<0.000000e+00> : vector<4x1xf32>
    %12 = vector.multi_reduction <add>, %11, %cst_5 [0] : vector<2x4x1xf32> to vector<4x1xf32>
    %13 = vector.shape_cast %12 : vector<4x1xf32> to vector<1x4x1xf32>
    %cst_6 = arith.constant 0.001953125 : f32
    %14 = vector.broadcast %cst_6 : f32 to vector<1x4x1xf32>
    %15 = arith.mulf %13, %14 : vector<1x4x1xf32>
    %cst_7 = arith.constant 0.000000e+00 : f32
    %16 = vector.broadcast %cst_7 : f32 to vector<1x4x1xf32>
    %17 = arith.maximumf %15, %16 : vector<1x4x1xf32>
    %c0_8 = arith.constant 0 : index
    %c0_9 = arith.constant 0 : index
    %c0_10 = arith.constant 0 : index
    %18 = vector.load %arg2[%c0_8, %c0_9, %c0_10] : memref<1x4x1xf32, #tpu.memory_space<vmem>>, vector<1x4x1xf32>
    %cst_11 = arith.constant 9.99999974E-6 : f32
    %19 = vector.broadcast %cst_11 : f32 to vector<1x4x1xf32>
    %20 = arith.addf %17, %19 : vector<1x4x1xf32>
    %21 = math.rsqrt %20 : vector<1x4x1xf32>
    %22 = arith.mulf %18, %21 : vector<1x4x1xf32>
    %23 = vector.broadcast %22 : vector<1x4x1xf32> to vector<2x4x256xf32>
    %24 = arith.mulf %8, %23 : vector<2x4x256xf32>
    %c0_12 = arith.constant 0 : index
    %c0_13 = arith.constant 0 : index
    %c0_14 = arith.constant 0 : index
    %25 = vector.load %arg3[%c0_12, %c0_13, %c0_14] : memref<1x4x1xf32, #tpu.memory_space<vmem>>, vector<1x4x1xf32>
    %26 = vector.broadcast %25 : vector<1x4x1xf32> to vector<2x4x256xf32>
    %27 = arith.addf %24, %26 : vector<2x4x256xf32>
    %c0_15 = arith.constant 0 : index
    %c0_16 = arith.constant 0 : index
    %c0_17 = arith.constant 0 : index
    %28 = vector.load %arg4[%c0_15, %c0_16, %c0_17] : memref<2x4x256xf32, #tpu.memory_space<vmem>>, vector<2x4x256xf32>
    tpu.vector_store %arg4[%c0_15, %c0_16, %c0_17], %27 {strides = array<i32>} : memref<2x4x256xf32, #tpu.memory_space<vmem>>, vector<2x4x256xf32>,
    %c0_18 = arith.constant 0 : index
    %c0_19 = arith.constant 0 : index
    %c0_20 = arith.constant 0 : index
    %29 = vector.load %arg5[%c0_18, %c0_19, %c0_20] : memref<1x4x1xf32, #tpu.memory_space<vmem>>, vector<1x4x1xf32>
    tpu.vector_store %arg5[%c0_18, %c0_19, %c0_20], %6 {strides = array<i32>} : memref<1x4x1xf32, #tpu.memory_space<vmem>>, vector<1x4x1xf32>,
    %c0_21 = arith.constant 0 : index
    %c0_22 = arith.constant 0 : index
    %c0_23 = arith.constant 0 : index
    %30 = vector.load %arg6[%c0_21, %c0_22, %c0_23] : memref<1x4x1xf32, #tpu.memory_space<vmem>>, vector<1x4x1xf32>
    tpu.vector_store %arg6[%c0_21, %c0_22, %c0_23], %17 {strides = array<i32>} : memref<1x4x1xf32, #tpu.memory_space<vmem>>, vector<1x4x1xf32>,
    return
  }
  func.func @transform_0(%arg0: i32) -> (i32, i32, i32) {
    %c0_i32 = arith.constant 0 : i32
    %c0_i32_0 = arith.constant 0 : i32
    %c0_i32_1 = arith.constant 0 : i32
    return %c0_i32, %arg0, %c0_i32_0 : i32, i32, i32
  }
  func.func @transform_1(%arg0: i32) -> (i32, i32, i32) {
    %c0_i32 = arith.constant 0 : i32
    %c0_i32_0 = arith.constant 0 : i32
    %c0_i32_1 = arith.constant 0 : i32
    return %c0_i32, %arg0, %c0_i32_0 : i32, i32, i32
  }
  func.func @transform_2(%arg0: i32) -> (i32, i32, i32) {
    %c0_i32 = arith.constant 0 : i32
    %c0_i32_0 = arith.constant 0 : i32
    %c0_i32_1 = arith.constant 0 : i32
    return %c0_i32, %arg0, %c0_i32_0 : i32, i32, i32
  }
  func.func @transform_3(%arg0: i32) -> (i32, i32, i32) {
    %c0_i32 = arith.constant 0 : i32
    %c0_i32_0 = arith.constant 0 : i32
    %c0_i32_1 = arith.constant 0 : i32
    return %c0_i32, %arg0, %c0_i32_0 : i32, i32, i32
  }
  func.func @transform_4(%arg0: i32) -> (i32, i32, i32) {
    %c0_i32 = arith.constant 0 : i32
    %c0_i32_0 = arith.constant 0 : i32
    %c0_i32_1 = arith.constant 0 : i32
    return %c0_i32, %arg0, %c0_i32_0 : i32, i32, i32
  }
  func.func @transform_5(%arg0: i32) -> (i32, i32, i32) {
    %c0_i32 = arith.constant 0 : i32
    %c0_i32_0 = arith.constant 0 : i32
    %c0_i32_1 = arith.constant 0 : i32
    return %c0_i32, %arg0, %c0_i32_0 : i32, i32, i32
  }
}

</mosaic_0001>

<bundles_post_ra>
// kernel: tpu_custom_call.1
= control target key start
LH: loop header
LB: loop body
LE: loop exit
PB: predicated region body
PF: predicated region fallthrough
CT: control target
= control target key end

     0   :  { %11 = vsyncpa [#allocation3], 0  ;;  %s282_s0 = inlined_call_operand.hbm [shape: f32[2,4,256], index: 0, kind: input, shape index: {}]   ;;  %s283_s1 = inlined_call_operand.vmem [shape: f32[1,4,1], index: 1, kind: input, shape index: {}]   ;;  %s284_s2 = inlined_call_operand.vmem [shape: f32[1,4,1], index: 2, kind: input, shape index: {}]   ;;  %s285_s3 = inlined_call_operand.hbm [shape: f32[2,4,256], index: 3, kind: output, shape index: {0}]   ;;  %s286_s4 = inlined_call_operand.vmem [shape: f32[1,4,1], index: 4, kind: output, shape index: {1}]   ;;  %s287_s5 = inlined_call_operand.vmem [shape: f32[1,4,1], index: 5, kind: output, shape index: {2}]  }
   0x1   :  { %12 = vsyncpa [#allocation4], 0  ;;  %s208_s18 = smov [#allocation2]  }
   0x2   :  { %s18_s19 = sshll.u32 %s208_s18, 4  ;;  %s19_s19 = int_to_ptr.vmem [resolvable:$true] %s18_s19 }
   0x3   :  { %s172_s20 = scalar_lea.vmem %s19_s19, 256  ;;  %p177_p1 = scmp.lt.s32.totalorder %s19_s19, %s19_s19 }
   0x4   :  { %p173_p0 = scmp.ne.s32.totalorder %s19_s19, %s172_s20  ;;  %p178_p2 = scmp.lt.s32.totalorder %s172_s20, %s172_s20 }
   0x6   :  { %p179_p3 = por %p178_p2, %p177_p1 }
   0x8   :  { %p180_p4 = pnand %p179_p3, %p173_p0 }
   0xa   :  { %183 = shalt.err (!%p180_p4)
}
   0xb   :  { %s209_s21 = smov 128   ;;  %s210_s22 = smov 8  }
   0xc   :  { %24 = dma.hbm_to_vmem [thread:$0]  %s282_s0, 256, %s19_s19, [#allocation3], %s209_s21, %s209_s21, %s210_s22  }
   0xd   :  { %204 = dma.done.wait [#allocation3], 256  }
   0xe   :  { %205 = vsyncadd [#allocation3], 4294967040  ;;  %vm40_vm0 = vcmask 1043456   ;;  %v32_v0 = vld [vmem:[#allocation2] sm:$0xff]  ;;  %v33_v1 = vld [vmem:[#allocation2 + $0x8] sm:$0xff]  ;;  %v59_v12 = vlaneseq  ;;  %vm124_vm1 = vcmask 3072  }
   0xf   :  { %v36_v2 = vcombine.high %v32_v0, %v32_v0  ;;  %v41_v3 = vsel %vm40_vm0, %v32_v0, 0.0  ;;  %v37_v4 = vcombine.high %v33_v1, %v33_v1  ;;  %v46_v6 = vsel %vm40_vm0, %v33_v1, 0.0  ;;  %v107_v36 = vld [vmem:[%s284_s2] sm:$0xf]  ;;  %s213_s2 = smov [#allocation5]  }
  0x10   :  { %v211_v10 = vmov 839922192   ;;  %v60_v15 = vshrl.u32 %v59_v12, 7  ;;  %v212_v35 = vmov 0   ;;  %v89_v45 = vld [vmem:[%s283_s1] sm:$0xf] }
  0x11   :  { %v42_v5 = vsel %vm40_vm0, %v36_v2, 0.0  ;;  %v47_v7 = vsel %vm40_vm0, %v37_v4, 0.0  ;;  %v57_v11 = vunpack.c.l.s4 %v211_v10  ;;  %158 = vset.pattern.permute.xlu0 %v212_v35  ;;  %159 = vset.pattern.permute.xlu1 %v212_v35  ;;  %s132_s6 = sshll.u32 %s213_s2, 4  ;;  %s133_s6 = int_to_ptr.vmem [resolvable:$true] %s132_s6 }
  0x12   :  { %v43_v8 = vadd.f32 %v42_v5, %v41_v3  ;;  %v48_v9 = vadd.f32 %v47_v7, %v46_v6  ;;  %p189_p6 = scmp.lt.s32.totalorder %s133_s6, %s133_s6 }
  0x13   :  { %v58_v14 = vunpack.c.0.s8 %v57_v11 }
  0x14   :  { %44 = vadd.xlane.f32.xlu0 %v43_v8 }
  0x15   :  { %v61_v19 = vsub.s32 %v58_v14, %v60_v15 }
  0x18   :  { %49 = vadd.xlane.f32.xlu0 %v48_v9 }
  0x9d   :  { %v45_v13 = vpop.xlane.xlu0 %44 }
  0x9e   :  { %v51_v17 = vsel %vm40_vm0, %v45_v13, 0.0 }
  0xa1   :  { %v50_v16 = vpop.xlane.xlu0 %49 }
  0xa2   :  { %v52_v18 = vsel %vm40_vm0, %v50_v16, 0.0 }
  0xa3   :  { %v53_v20 = vadd.f32 %v52_v18, %v51_v17 }
  0xa5   :  { %v54_v21 = vmul.f32 0.001953125, %v53_v20 }
  0xa7   :  { %v62_v22 = vrot.slane %v54_v21, %v61_v19  ;;  %125 = vst.msk [vmem:[%s286_s4] sm:$0xf] %vm124_vm1, %v54_v21 }
  0xa9   :  { %v65_v23 = vsub.f32 %v33_v1, %v62_v22  ;;  %v64_v24 = vsub.f32 %v32_v0, %v62_v22 }
  0xab   :  { %v66_v25 = vmul.f32 %v64_v24, %v64_v24  ;;  %v67_v26 = vmul.f32 %v65_v23, %v65_v23 }
  0xad   :  { %v70_v27 = vcombine.high %v66_v25, %v66_v25  ;;  %v71_v28 = vcombine.high %v67_v26, %v67_v26  ;;  %v74_v29 = vsel %vm40_vm0, %v66_v25, 0.0  ;;  %v79_v33 = vsel %vm40_vm0, %v67_v26, 0.0 }
  0xaf   :  { %v75_v30 = vsel %vm40_vm0, %v70_v27, 0.0  ;;  %v80_v32 = vsel %vm40_vm0, %v71_v28, 0.0 }
  0xb0   :  { %v76_v31 = vadd.f32 %v75_v30, %v74_v29  ;;  %v81_v34 = vadd.f32 %v80_v32, %v79_v33 }
  0xb2   :  { %77 = vadd.xlane.f32.xlu1 %v76_v31 }
  0xb6   :  { %82 = vadd.xlane.f32.xlu1 %v81_v34 }
  0xc7   :  { %110 = vperm.xlu1 %159, %v107_v36  }
 0x13b   :  { %v78_v37 = vpop.xlane.xlu1 %77 }
 0x13c   :  { %v84_v39 = vsel %vm40_vm0, %v78_v37, 0.0 }
 0x13f   :  { %v83_v38 = vpop.xlane.xlu1 %82 }
 0x140   :  { %v85_v40 = vsel %vm40_vm0, %v83_v38, 0.0 }
 0x141   :  { %v86_v41 = vadd.f32 %v85_v40, %v84_v39 }
 0x143   :  { %v87_v42 = vmul.f32 0.001953125, %v86_v41  ;;  %v111_v48 = vpop.permute.xlu1 %110 }
 0x144   :  { %v118_v51 = vrot.slane %v111_v48, %v61_v19 }
 0x145   :  { %v88_v43 = vmax.f32 %v87_v42, 0.0 }
 0x147   :  { %v90_v44 = vadd.f32 1e-05, %v88_v43  ;;  %126 = vst.msk [vmem:[%s287_s5] sm:$0xf] %vm124_vm1, %v88_v43  ;;  %s184_s5 = scalar_lea.vmem %s133_s6, 256 }
 0x148   :  { %p185_p5 = scmp.ne.s32.totalorder %s133_s6, %s184_s5  ;;  %p190_p7 = scmp.lt.s32.totalorder %s184_s5, %s184_s5 }
 0x149   :  { %162 = vrsqrt.f32 %v90_v44 }
 0x14a   :  { %p191_p8 = por %p190_p7, %p189_p6 }
 0x14c   :  { %p192_p9 = pnand %p191_p8, %p185_p5 }
 0x156   :  { %v163_v46 = vpop.eup %162 }
 0x157   :  { %v92_v47 = vmul.f32 %v163_v46, %v89_v45 }
 0x159   :  { %95 = vperm.xlu0 %158, %v92_v47  }
 0x1d4   :  { %v96_v49 = vpop.permute.xlu0 %95 }
 0x1d5   :  { %v103_v50 = vrot.slane %v96_v49, %v61_v19 }
 0x1d7   :  { %v105_v52 = vmul.f32 %v103_v50, %v64_v24  ;;  %v106_v53 = vmul.f32 %v103_v50, %v65_v23 }
 0x1d9   :  { %v120_v54 = vadd.f32 %v118_v51, %v105_v52  ;;  %v121_v55 = vadd.f32 %v118_v51, %v106_v53 }
 0x1db   :  { %122 = vst [vmem:[#allocation5] sm:$0xff] %v120_v54  ;;  %123 = vst [vmem:[#allocation5 + $0x8] sm:$0xff] %v121_v55 }
 0x1dc   :  { %195 = shalt.err (!%p192_p9)
}
 0x1dd   :  { %138 = dma.vmem_to_hbm [thread:$0]  %s133_s6, 256, %s285_s3, [#allocation4], %s209_s21, %s209_s21, %s210_s22  }
 0x1de   :  { %206 = dma.done.wait [#allocation4], 256  }
 0x1df   :  { %207 = vsyncadd [#allocation4], 4294967040 }
 0x1e0   :  { %150 = vsyncpa [#allocation3], 1 }
 0x1e1   :  { %151 = vsyncpa [#allocation4], 1 }

</bundles_post_ra>
